<compile_context>
chip_gen: v6e
topology: v6e:2x2x1
jax: 0.10.0
libtpu: 0.0.40
codegen_flags: <defaults>
</compile_context>

<pallas_src>
import jax
import jax.numpy as jnp
from jax.experimental import pallas as pl
from jax.experimental.pallas import tpu as pltpu


def _round_up(n, m):
    return ((n + m - 1) // m) * m


# ---------------------------------------------------------------------------
# Kernel: one (tile_m, D) row tile ->  out = x @ W + b + x
# ---------------------------------------------------------------------------
def residual_add_kernel(x_ref, w_ref, b_ref, o_ref):
    x = x_ref[...]                                     # (tile_m, D) native dtype
    x_f32 = x.astype(jnp.float32)
    y = jnp.dot(x.astype(jnp.bfloat16), w_ref[...],    # bf16 MXU, f32 accumulate
                preferred_element_type=jnp.float32)
    y = y + b_ref[...] + x_f32                         # bias + residual in f32
    o_ref[...] = y.astype(o_ref.dtype)


# ---------------------------------------------------------------------------
# Host-side helpers
# ---------------------------------------------------------------------------
def prepare_linear_params(w, b):
    """Pre-cast the wrapped Linear's params ONCE (hoisted out of the hot path)."""
    D = w.shape[0]
    return w.astype(jnp.bfloat16), b.reshape(1, D).astype(jnp.float32)


def _vmem_capacity_bytes():
    try:
        return int(pltpu.get_tpu_info().vmem_capacity_bytes)
    except Exception:
        return 64 * 1024 * 1024            # conservative: v7x per-TC VMEM


def _choose_tile_m(M, tile_m_max):
    """Sublane-aligned tiles; even step count >= 2 when M allows (megacore)."""
    if M <= 8:
        return 8
    n_steps = max(2, pl.cdiv(M, tile_m_max))
    if n_steps % 2:
        n_steps += 1                        # even -> both v7x TCs get equal work
    return min(tile_m_max, _round_up(pl.cdiv(M, n_steps), 8))


def _vmem_bytes(tile_m, D, x_itemsize, o_itemsize, w_buffers):
    x_bytes = 2 * tile_m * D * x_itemsize   # double-buffered input tiles
    o_bytes = 2 * tile_m * D * o_itemsize   # double-buffered output tiles
    w_bytes = w_buffers * D * D * 2         # bf16 weights (resident)
    b_bytes = w_buffers * 8 * D * 4         # bias, padded to 8 sublanes
    return x_bytes + o_bytes + w_bytes + b_bytes


def residual_add(x, w_bf16, b_f32, *, tile_m=None):
    """ResidualAdd(Linear): out = x @ W + b + x.

    x      : (B, N, D), f32 or bf16 (output keeps x.dtype).
    w_bf16 : (D, D) bf16  -- from prepare_linear_params().
    b_f32  : (1, D) f32   -- from prepare_linear_params().
    """
    B, N, D = x.shape
    assert D % 128 == 0, "hidden dim must be lane-dense (multiple of 128)"
    assert w_bf16.shape == (D, D) and b_f32.shape == (1, D)

    M = B * N
    x2d = x.reshape(M, D)                   # contiguous metadata reshape (free)

    vmem_cap = _vmem_capacity_bytes()
    tile_m_max = 2048 if vmem_cap >= 100 * (1 << 20) else 1024
    if tile_m is None:
        tile_m = _choose_tile_m(M, tile_m_max)
    assert tile_m % 8 == 0, "tile_m must be a multiple of 8 (sublane granularity)"

    # Shrink tile_m if the VMEM footprint would not fit the budget.
    # TODO(synk): for D >= 2048 add a K-tiled (M_tiles, K_tiles) variant with an
    # f32 scratch accumulator instead of shrinking tile_m (resident W too big).
    budget = (3 * vmem_cap) // 4
    itemsize = x.dtype.itemsize
    while _vmem_bytes(tile_m, D, itemsize, itemsize, 1) > budget and tile_m > 8:
        tile_m = max(8, _round_up(tile_m // 2, 8))

    grid = (pl.cdiv(M, tile_m),)            # partial last block handled by Pallas
    need = _vmem_bytes(tile_m, D, itemsize, itemsize, 2)   # worst case: 2x W
    vmem_limit = min(max(int(need * 1.25) + (2 << 20), 32 << 20), budget)

    def call(single_buffer_resident):
        resident_kwargs = (
            dict(pipeline_mode=pl.Buffered(1)) if single_buffer_resident else {}
        )
        return pl.pallas_call(
            residual_add_kernel,
            out_shape=jax.ShapeDtypeStruct((M, D), x.dtype),
            grid=grid,
            in_specs=[
                pl.BlockSpec((tile_m, D), lambda i: (i, 0)),          # x: M-tiled
                pl.BlockSpec((D, D), lambda i: (0, 0), **resident_kwargs),  # W
                pl.BlockSpec((1, D), lambda i: (0, 0), **resident_kwargs),  # b
            ],
            out_specs=pl.BlockSpec((tile_m, D), lambda i: (i, 0)),
            compiler_params=pltpu.CompilerParams(
                dimension_semantics=("parallel",),    # megacore-shard row tiles
                vmem_limit_bytes=vmem_limit,
            ),
        )(x2d, w_bf16, b_f32)

    try:
        out = call(single_buffer_resident=True)
    except Exception:
        # pl.Buffered(1) not supported by this JAX build -> default buffering.
        out = call(single_buffer_resident=False)

    return out.reshape(B, N, D)


def residual_add_ref(x, w_bf16, b_f32):
    # Same numerics as the kernel: bf16 MXU operands, f32 accumulate + residual.
    y = jnp.einsum("bnd,de->bne", x.astype(jnp.bfloat16), w_bf16,
                   preferred_element_type=jnp.float32)
    y = y + b_f32 + x.astype(jnp.float32)
    return y.astype(x.dtype)


if __name__ == "__main__":
    D = 128
    key = jax.random.PRNGKey(0)
    kx, kw, kb, kx2 = jax.random.split(key, 4)

    # Deterministic "fn" parameters (Linear D->D); cast/reshape hoisted: done once.
    w = jax.random.normal(kw, (D, D), dtype=jnp.float32) * (1.0 / jnp.sqrt(D))
    b = jax.random.normal(kb, (D,), dtype=jnp.float32) * 0.01
    w_bf16, b_f32 = prepare_linear_params(w, b)

    def check(x, tol):
        out = jax.block_until_ready(residual_add(x, w_bf16, b_f32))
        ref = residual_add_ref(x, w_bf16, b_f32)
        assert out.shape == x.shape and out.dtype == x.dtype
        assert jnp.allclose(out.astype(jnp.float32), ref.astype(jnp.float32),
                            atol=tol, rtol=tol), "mismatch vs reference"

    # 1) f32, M=16 -> tile_m=8, grid=(2,): multi-step pipeline, both TCs busy.
    x = jax.random.normal(kx, (2, 8, D), dtype=jnp.float32)
    check(x, tol=1e-3)

    # 2) Ragged M (DeiT-style odd token count, M=14): partial last block handled
    #    by Pallas boundary masking -- no pad / slice HBM round-trip.
    x_ragged = jax.random.normal(kx2, (2, 7, D), dtype=jnp.float32)
    check(x_ragged, tol=1e-3)

    # 3) bf16 activations in / bf16 out (halves HBM traffic in a bf16 model).
    check(x.astype(jnp.bfloat16), tol=4e-2)

    print("KERNEL_OK")
</pallas_src>

<mosaic_0001>
module attributes {stable_mosaic.version = 11 : i64} {
  func.func @residual_add_kernel(%arg0: i32, %arg1: memref<8x128xf32, #tpu.memory_space<vmem>>, %arg2: memref<128x128xbf16, #tpu.memory_space<vmem>>, %arg3: memref<1x128xf32, #tpu.memory_space<vmem>>, %arg4: memref<8x128xf32, #tpu.memory_space<vmem>>) attributes {dimension_semantics = [#tpu.dimension_semantics<parallel>], iteration_bounds = array<i64: 2>, scalar_prefetch = 0 : i64, scratch_operands = 0 : i64, tpu.core_type = #tpu.core_type<tc>, window_params = [{transform_indices = @transform_0, window_bounds = array<i64: 8, 128>}, {pipeline_mode = #tpu.pipeline_mode<synchronous>, transform_indices = @transform_1, window_bounds = array<i64: 128, 128>}, {pipeline_mode = #tpu.pipeline_mode<synchronous>, transform_indices = @transform_2, window_bounds = array<i64: 1, 128>}, {transform_indices = @transform_3, window_bounds = array<i64: 8, 128>}]} {
    %c0 = arith.constant 0 : index
    %c0_0 = arith.constant 0 : index
    %0 = vector.load %arg1[%c0, %c0_0] : memref<8x128xf32, #tpu.memory_space<vmem>>, vector<8x128xf32>
    %1 = arith.truncf %0 : vector<8x128xf32> to vector<8x128xbf16>
    %c0_1 = arith.constant 0 : index
    %c0_2 = arith.constant 0 : index
    %2 = vector.load %arg2[%c0_1, %c0_2] : memref<128x128xbf16, #tpu.memory_space<vmem>>, vector<128x128xbf16>
    %cst = arith.constant dense<0.000000e+00> : vector<8x128xf32>
    %3 = tpu.matmul %1, %2, %cst {dimension_numbers = #tpu.dot_dimension_numbers<[1], [0], [0], [1], [0, 0, 1, 1], [], []>} : vector<8x128xbf16>, vector<128x128xbf16>, vector<8x128xf32> -> vector<8x128xf32>
    %c0_3 = arith.constant 0 : index
    %c0_4 = arith.constant 0 : index
    %4 = vector.load %arg3[%c0_3, %c0_4] : memref<1x128xf32, #tpu.memory_space<vmem>>, vector<1x128xf32>
    %5 = vector.broadcast %4 : vector<1x128xf32> to vector<8x128xf32>
    %6 = arith.addf %3, %5 : vector<8x128xf32>
    %7 = arith.addf %6, %0 : vector<8x128xf32>
    %c0_5 = arith.constant 0 : index
    %c0_6 = arith.constant 0 : index
    %8 = vector.load %arg4[%c0_5, %c0_6] : memref<8x128xf32, #tpu.memory_space<vmem>>, vector<8x128xf32>
    tpu.vector_store %arg4[%c0_5, %c0_6], %7 {strides = array<i32>} : memref<8x128xf32, #tpu.memory_space<vmem>>, vector<8x128xf32>,
    return
  }
  func.func @transform_0(%arg0: i32) -> (i32, i32) {
    %c0_i32 = arith.constant 0 : i32
    %c0_i32_0 = arith.constant 0 : i32
    return %arg0, %c0_i32 : i32, i32
  }
  func.func @transform_1(%arg0: i32) -> (i32, i32) {
    %c0_i32 = arith.constant 0 : i32
    %c0_i32_0 = arith.constant 0 : i32
    %c0_i32_1 = arith.constant 0 : i32
    return %c0_i32, %c0_i32_0 : i32, i32
  }
  func.func @transform_2(%arg0: i32) -> (i32, i32) {
    %c0_i32 = arith.constant 0 : i32
    %c0_i32_0 = arith.constant 0 : i32
    %c0_i32_1 = arith.constant 0 : i32
    return %c0_i32, %c0_i32_0 : i32, i32
  }
  func.func @transform_3(%arg0: i32) -> (i32, i32) {
    %c0_i32 = arith.constant 0 : i32
    %c0_i32_0 = arith.constant 0 : i32
    return %arg0, %c0_i32 : i32, i32
  }
}

module attributes {stable_mosaic.version = 11 : i64} {
  func.func @residual_add_kernel(%arg0: i32, %arg1: memref<8x128xf32, #tpu.memory_space<vmem>>, %arg2: memref<128x128xbf16, #tpu.memory_space<vmem>>, %arg3: memref<1x128xf32, #tpu.memory_space<vmem>>, %arg4: memref<8x128xf32, #tpu.memory_space<vmem>>) attributes {dimension_semantics = [#tpu.dimension_semantics<parallel>], iteration_bounds = array<i64: 2>, scalar_prefetch = 0 : i64, scratch_operands = 0 : i64, tpu.core_type = #tpu.core_type<tc>, window_params = [{transform_indices = @transform_0, window_bounds = array<i64: 8, 128>}, {pipeline_mode = #tpu.pipeline_mode<synchronous>, transform_indices = @transform_1, window_bounds = array<i64: 128, 128>}, {pipeline_mode = #tpu.pipeline_mode<synchronous>, transform_indices = @transform_2, window_bounds = array<i64: 1, 128>}, {transform_indices = @transform_3, window_bounds = array<i64: 8, 128>}]} {
    %c0 = arith.constant 0 : index
    %c0_0 = arith.constant 0 : index
    %0 = vector.load %arg1[%c0, %c0_0] : memref<8x128xf32, #tpu.memory_space<vmem>>, vector<8x128xf32>
    %1 = arith.truncf %0 : vector<8x128xf32> to vector<8x128xbf16>
    %c0_1 = arith.constant 0 : index
    %c0_2 = arith.constant 0 : index
    %2 = vector.load %arg2[%c0_1, %c0_2] : memref<128x128xbf16, #tpu.memory_space<vmem>>, vector<128x128xbf16>
    %cst = arith.constant dense<0.000000e+00> : vector<8x128xf32>
    %3 = tpu.matmul %1, %2, %cst {dimension_numbers = #tpu.dot_dimension_numbers<[1], [0], [0], [1], [0, 0, 1, 1], [], []>} : vector<8x128xbf16>, vector<128x128xbf16>, vector<8x128xf32> -> vector<8x128xf32>
    %c0_3 = arith.constant 0 : index
    %c0_4 = arith.constant 0 : index
    %4 = vector.load %arg3[%c0_3, %c0_4] : memref<1x128xf32, #tpu.memory_space<vmem>>, vector<1x128xf32>
    %5 = vector.broadcast %4 : vector<1x128xf32> to vector<8x128xf32>
    %6 = arith.addf %3, %5 : vector<8x128xf32>
    %7 = arith.addf %6, %0 : vector<8x128xf32>
    %c0_5 = arith.constant 0 : index
    %c0_6 = arith.constant 0 : index
    %8 = vector.load %arg4[%c0_5, %c0_6] : memref<8x128xf32, #tpu.memory_space<vmem>>, vector<8x128xf32>
    tpu.vector_store %arg4[%c0_5, %c0_6], %7 {strides = array<i32>} : memref<8x128xf32, #tpu.memory_space<vmem>>, vector<8x128xf32>,
    return
  }
  func.func @transform_0(%arg0: i32) -> (i32, i32) {
    %c0_i32 = arith.constant 0 : i32
    %c0_i32_0 = arith.constant 0 : i32
    return %arg0, %c0_i32 : i32, i32
  }
  func.func @transform_1(%arg0: i32) -> (i32, i32) {
    %c0_i32 = arith.constant 0 : i32
    %c0_i32_0 = arith.constant 0 : i32
    %c0_i32_1 = arith.constant 0 : i32
    return %c0_i32, %c0_i32_0 : i32, i32
  }
  func.func @transform_2(%arg0: i32) -> (i32, i32) {
    %c0_i32 = arith.constant 0 : i32
    %c0_i32_0 = arith.constant 0 : i32
    %c0_i32_1 = arith.constant 0 : i32
    return %c0_i32, %c0_i32_0 : i32, i32
  }
  func.func @transform_3(%arg0: i32) -> (i32, i32) {
    %c0_i32 = arith.constant 0 : i32
    %c0_i32_0 = arith.constant 0 : i32
    return %arg0, %c0_i32 : i32, i32
  }
}

</mosaic_0001>

<bundles_post_ra>
// kernel: tpu_custom_call.1
= control target key start
LH: loop header
LB: loop body
LE: loop exit
PB: predicated region body
PF: predicated region fallthrough
CT: control target
= control target key end

     0   :  { %8 = vsyncpa [#allocation3], 0  ;;  %s856_s0 = inlined_call_operand.hbm [shape: f32[16,128], index: 0, kind: input, shape index: {}]   ;;  %s857_s1 = inlined_call_operand.hbm [shape: bf16[128,128], index: 1, kind: input, shape index: {}]   ;;  %s858_s2 = inlined_call_operand.vmem [shape: f32[1,128], index: 2, kind: input, shape index: {}]   ;;  %s859_s3 = inlined_call_operand.hbm [shape: f32[16,128], index: 3, kind: output, shape index: {}]  }
   0x1   :  { %10 = vsyncpa [#allocation3 + $0x1], 0 }
   0x2   :  { %11 = vsyncpa [#allocation6], 0 }
   0x3   :  { %12 = vsyncpa [#allocation4], 0 }
   0x4   :  { %14 = vsyncpa [#allocation4 + $0x1], 0  ;;  %s683_s12 = smov 0   ;;  %s685_s13 = smov 0  }
   0x5   :  { %s687_s14 = smov 0   ;;  %s689_s15 = smov 0  }
   0x6 LB: > { %s704_s16 = sadd.s32 4294967295, %s654_s15   ;;  %s411_s17 = sadd.s32 4294967294, %s654_s15   ;;  %s654_s15 = sphi %s689_s15, %s881_s15   ;;  %s650_s14 = sphi %s687_s14, %s880_s14   ;;  %s646_s13 = sphi %s685_s13, %s879_s13   ;;  %s642_s12 = sphi %s683_s12, %s878_s12  }
   0x7   : > { %p40_p0 = scmp.ne.s32.totalorder %s646_s13, %s642_s12  ;;  %p860_p1 = scmp.eq.s32.totalorder %s704_s16, 0 }
   0x8   : > { %p112_p3 = scmp.eq.s32.totalorder %s411_s17, 1  ;;  %p412_p5 = scmp.ge.s32.totalorder %s654_s15, 1 }
   0x9   : > { %p713_p4 = por %p860_p1, %p40_p0  ;;  %p119_p7 = scmp.lt.s32.totalorder %s654_s15, 3 }
   0xa   : > { %p718_p6 = por %p112_p3, %p40_p0  ;;  %s656_s21 = smov [#allocation5]  }
   0xb   : > { %s864_s18 = scalar_select %p713_p4, 1, 0 }
   0xc   : > { %s865_s19 = scalar_select %p718_p6, 1, 0 }
   0xd   : > { %p723_p8 = pnand %p412_p5, %p119_p7  ;;  %s131_s22 = sshll.u32 %s656_s21, 4  ;;  %s132_s22 = int_to_ptr.vmem [resolvable:$true] %s131_s22 }
   0xe   : > { %s737_s24 = sadd.s32 1, %s654_s15   ;;  %s27_s25 = sadd.s32 1, %s650_s14 }
   0xf   : > { %s866_s20 = scalar_select %p723_p8, 1, 0 }
  0x10   : > { %p471_p9 = pneg %p723_p8  ;;  %s24_s26 = ssub.s32 %s654_s15, %s737_s24 }
  0x11   : > { %s543_s27 = scalar_lea.vmem %s132_s22, 1024  ;;  %p551_p5 = scmp.lt.s32.totalorder %s132_s22, %s132_s22 }
  0x12   : > { %p732_p11 = pnand %p471_p9, %p860_p1  ;;  %p544_p13 = scmp.ne.s32.totalorder %s132_s22, %s543_s27 }
  0x13   : > { %p552_p7 = scmp.lt.s32.totalorder %s543_s27, %s543_s27 }
  0x14   : > { %p534_p12 = pneg %p732_p11 }
  0x15   : > { %p553_p10 = por %p552_p7, %p551_p5 }
  0x16   : > { %p546_p0 = pnand %p544_p13, %p534_p12 }
  0x18   : > { %p547_p3 = pneg %p546_p0 }
  0x1a   : > { %p554_p2 = pnand %p553_p10, %p547_p3 }
  0x1c   : > { %557 = shalt.err (!%p554_p2)
}
  0x1d   : > { %s657_s28 = smov 64   ;;  %s658_s29 = smov 4  }
  0x1e   : > { %474 = dma.hbm_to_vmem [thread:$0]  (!%p732_p11), %s857_s1, 1024, %s132_s22, [#allocation6], %s657_s28, %s657_s28, %s658_s29  }
  0x1f   : > { %p25_p9 = scmp.eq.s32.totalorder %s24_s26, 0  ;;  %p34_p12 = scmp.ne.s32.totalorder %s650_s14, %s646_s13 }
  0x20   : > { %p35_p10 = scmp.eq.s32.totalorder %s654_s15, 0  ;;  %p484_p2 = scmp.lt.s32.totalorder %s654_s15, 2 }
  0x21   : > { %s754_s5 = scalar_select %p25_p9, %s650_s14, %s27_s25  }
  0x22   : > { %p36_p13 = por %p35_p10, %p34_p12  ;;  %p868_p0 = scmp.eq.s32.totalorder %s704_s16, 1 }
  0x23   : > { %s148_s7 = sand.u32 1, %s650_s14   ;;  %s416_s8 = sshll.u32 %s654_s15, 7 }
  0x24   : > { %p758_p3 = por %p868_p0, %p34_p12  ;;  %s415_s9 = sshll.u32 %s148_s7, 3 }
  0x25   : > { %s767_s17 = scalar_lea.hbm %s856_s0, %s416_s8  ;;  %s152_s21 = scalar_lea.vmem [#allocation2], %s415_s9 }
  0x26   : > { %s869_s6 = scalar_select %p758_p3, 1, 0 }
  0x27   : > { %s159_s22 = sshll.u32 %s152_s21, 4  ;;  %p769_p11 = pnand %p484_p2, %p36_p13  ;;  %s160_s22 = int_to_ptr.vmem [resolvable:$true] %s159_s22 }
  0x28   : > { %s149_s25 = scalar_lea.sflag [#allocation3], %s148_s7  ;;  %s558_s26 = scalar_lea.hbm %s767_s17, 128 }
  0x29   : > { %p559_p5 = scmp.ne.s32.totalorder %s767_s17, %s558_s26  ;;  %p560_p7 = pneg %p769_p11 }
  0x2a   : > { %s563_s29 = scalar_lea.hbm %s856_s0, 256  ;;  %p564_p10 = scmp.lt.s32.totalorder %s767_s17, %s856_s0 }
  0x2b   : > { %p561_p9 = pnand %p560_p7, %p559_p5  ;;  %p565_p2 = scmp.lt.s32.totalorder %s563_s29, %s558_s26 }
  0x2d   : > { %p562_p12 = pneg %p561_p9  ;;  %p566_p13 = por %p565_p2, %p564_p10 }
  0x2f   : > { %p567_p0 = pnand %p566_p13, %p562_p12 }
  0x31   : > { %570 = shalt.err (!%p567_p0)
}
  0x32   : > { %s571_s8 = scalar_lea.vmem %s160_s22, 128  ;;  %s659_s7 = smov [#allocation2]  }
  0x33   : > { %p572_p1 = scmp.ne.s32.totalorder %s160_s22, %s571_s8  ;;  %s576_s9 = sshll.u32 %s659_s7, 4  ;;  %s577_s9 = int_to_ptr.vmem [resolvable:$false] %s576_s9 }
  0x34   : > { %s578_s10 = scalar_lea.vmem %s577_s9, 256  ;;  %p579_p5 = scmp.lt.s32.totalorder %s160_s22, %s577_s9 }
  0x35   : > { %p574_p6 = pnand %p572_p1, %p560_p7  ;;  %p580_p9 = scmp.lt.s32.totalorder %s578_s10, %s571_s8 }
  0x37   : > { %p575_p3 = pneg %p574_p6  ;;  %p581_p4 = por %p580_p9, %p579_p5 }
  0x39   : > { %p582_p8 = pnand %p581_p4, %p575_p3 }
  0x3b   : > { %585 = shalt.err (!%p582_p8)
}
  0x3c   : > { %478 = dma.hbm_to_vmem [thread:$0]  (!%p769_p11), %s767_s17, 128, %s160_s22, %s149_s25  }
  0x3d   : > { %p871_p12 = scmp.ne.s32.totalorder %s866_s20, 0 }
  0x3e   : > { %s790_s11 = sand.u32 (!%p871_p12), 1, %s646_s13   ;;  %p872_p1 = scmp.ne.s32.totalorder (!%p871_p12), %s864_s18, 0 }
  0x3f   : > { %168 = sbr.rel (%p871_p12) target bundleno = 316 (0x13c), region = 32  ;;  %s418_s21 = sshll.u32 (!%p871_p12), %s790_s11, 3 }
  0x40   : > { %s171_s26 = scalar_lea.sflag (!%p871_p12), [#allocation3], %s790_s11  ;;  %s174_s27 = scalar_lea.vmem (!%p871_p12), [#allocation2], %s418_s21 }
  0x44   : > { %629 = dma.done.wait (%p872_p1), %s171_s26, 128  }
  0x45   : > { %631 = vsyncadd (%p872_p1), %s171_s26, 4294967168  ;;  %p873_p4 = scmp.eq.s32.totalorder %s704_s16, 0 }
  0x47   : > { %633 = dma.done.wait (%p873_p4), [#allocation6], 1024   ;;  %p874_p6 = pmov %p873_p4 }
  0x48   : > { %v660_v0 = vmov 0.0   ;;  %vm661_vm0 = vmmov 0   ;;  %v524_v1 = vld [vmem:[#allocation5 + $0x38] sm:$0xff]   ;;  %v525_v2 = vld [vmem:[#allocation5 + $0x30] sm:$0xff]   ;;  %v526_v3 = vld [vmem:[#allocation5 + $0x28] sm:$0xff]   ;;  %s431_s17 = sshll.u32 %s704_s16, 7 }
  0x49   : > { %635 = vsyncadd (%p874_p6), [#allocation6], 4294966272  ;;  %443 = vmatprep.subr.bf16.mxu0 %v660_v0  ;;  %459 = vmatprep.mubr.msk.bf16.mxu0 %vm661_vm0, %v660_v0  ;;  %v527_v4 = vld [vmem:[#allocation5 + $0x20] sm:$0xff]   ;;  %v528_v5 = vld [vmem:[#allocation5 + $0x18] sm:$0xff]   ;;  %s200_s22 = scalar_lea.vmem [#allocation7], %s418_s21  ;;  %s813_s29 = scalar_lea.hbm %s859_s3, %s431_s17 }
  0x4a   : > { %444 = vmatpush3.bf16.msra.mxu0 %v524_v1  ;;  %v529_v6 = vld [vmem:[#allocation5 + $0x10] sm:$0xff]   ;;  %v530_v7 = vld [vmem:[#allocation5 + $0x8] sm:$0xff]   ;;  %v531_v8 = vld [vmem:[#allocation5] sm:$0xff]   ;;  %s331_s23 = sshll.u32 %s200_s22, 4  ;;  %s318_s16 = scalar_lea.sflag [#allocation4], %s790_s11  ;;  %s815_s23 = int_to_ptr.vmem [resolvable:$true] %s331_s23 }
  0x4b   : > { %445 = vmatprep.subr.bf16.mxu0 %v660_v0  ;;  %v202_v9 = vld [vmem:[%s174_s27] sm:$0xff]  ;;  %s586_s30 = scalar_lea.vmem %s815_s23, 128  ;;  %p875_p3 = scmp.ne.s32.totalorder %s869_s6, 0 }
  0x4c   : > { %v203_v10 = vpack.c.bf16 %v202_v9, %v202_v9  ;;  %v421_v11 = vld [vmem:[%s858_s2] ss:$0 sm:$0xff]  ;;  %p587_p8 = scmp.ne.s32.totalorder %s815_s23, %s586_s30  ;;  %s662_s4 = smov [#allocation7]  }
  0x4d   : > { %s590_s8 = sshll.u32 %s662_s4, 4  ;;  %s591_s8 = int_to_ptr.vmem [resolvable:$false] %s590_s8 }
  0x4e   : > { %446 = vmatpush3.bf16.msra.mxu0 %v525_v2  ;;  %p588_p11 = pnand %p587_p8, %p875_p3  ;;  %s592_s7 = scalar_lea.vmem %s591_s8, 256 }
  0x4f   : > { %447 = vmatprep.subr.bf16.mxu0 %v660_v0  ;;  %p593_p10 = scmp.lt.s32.totalorder %s815_s23, %s591_s8  ;;  %p594_p2 = scmp.lt.s32.totalorder %s592_s7, %s586_s30 }
  0x50   : > { %p589_p7 = pneg %p588_p11 }
  0x51   : > { %p595_p13 = por %p594_p2, %p593_p10 }
  0x52   : > { %448 = vmatpush3.bf16.msra.mxu0 %v526_v3 }
  0x53   : > { %449 = vmatprep.subr.bf16.mxu0 %v660_v0  ;;  %p596_p0 = pnand %p595_p13, %p589_p7 }
  0x56   : > { %450 = vmatpush3.bf16.msra.mxu0 %v527_v4 }
  0x57   : > { %451 = vmatprep.subr.bf16.mxu0 %v660_v0 }
  0x5a   : > { %452 = vmatpush3.bf16.msra.mxu0 %v528_v5 }
  0x5b   : > { %453 = vmatprep.subr.bf16.mxu0 %v660_v0 }
  0x5e   : > { %454 = vmatpush3.bf16.msra.mxu0 %v529_v6 }
  0x5f   : > { %455 = vmatprep.subr.bf16.mxu0 %v660_v0 }
  0x62   : > { %456 = vmatpush3.bf16.msra.mxu0 %v530_v7 }
  0x63   : > { %457 = vmatprep.subr.bf16.mxu0 %v660_v0 }
  0x66   : > { %458 = vmatpush3.bf16.msra.mxu0 %v531_v8 }
  0x69   : > { %460 = vmatmul.mubr.bf16.vlgmr.msra.gmra.mxu0 %v203_v10 }
 0x129   : > { %v309_v12 = vpop.f32.mrf.mxu0 }
 0x12a   : > { %v310_v13 = vadd.f32 %v421_v11, %v309_v12 }
 0x12b   : > { %v461_v14 = vpop.f32.mrf.mxu0 }
 0x12c   : > { %v315_v15 = vadd.f32 %v310_v13, %v202_v9 }
 0x12d   : > { %v312_v16 = vpop.f32.mrf.mxu0 }
 0x12e   : > { %316 = vst [vmem:[%s200_s22] sm:$0xff] %v315_v15 }
 0x12f   : > { %v462_v17 = vpop.f32.mrf.mxu0 }
 0x130   : > { %599 = shalt.err (!%p596_p0)
}
 0x131   : > { %s600_s9 = scalar_lea.hbm %s813_s29, 128  ;;  %s604_s21 = scalar_lea.hbm %s859_s3, 256 }
 0x132   : > { %p601_p5 = scmp.ne.s32.totalorder %s813_s29, %s600_s9  ;;  %p605_p1 = scmp.lt.s32.totalorder %s813_s29, %s859_s3 }
 0x133   : > { %p606_p4 = scmp.lt.s32.totalorder %s604_s21, %s600_s9 }
 0x134   : > { %p602_p9 = pnand %p601_p5, %p875_p3 }
 0x135   : > { %p607_p6 = por %p606_p4, %p605_p1 }
 0x136   : > { %p603_p12 = pneg %p602_p9 }
 0x138   : > { %p608_p8 = pnand %p607_p6, %p603_p12 }
 0x13a   : > { %611 = shalt.err (!%p608_p8)
}
 0x13b   : > { %469 = dma.vmem_to_hbm [thread:$0]  (%p875_p3), %s815_s23, 128, %s813_s29, %s318_s16  }
 0x13c PF: > { %s343_s18 = sand.u32 1, %s642_s12   ;;  %p876_p11 = scmp.ne.s32.totalorder %s865_s19, 0 }
 0x13d   : > { %p877_p7 = scmp.ge.s32.totalorder %s654_s15, 2  ;;  %s344_s20 = scalar_lea.sflag [#allocation4], %s343_s18 }
 0x13f   : > { %p480_p10 = pnand %p877_p7, %p876_p11 }
 0x141   : > { %p481_p2 = pneg %p480_p10 }
 0x143   : > { %637 = dma.done.wait (%p481_p2), %s344_s20, 128  }
 0x144   : > { %639 = vsyncadd (%p481_p2), %s344_s20, 4294967168  ;;  %p17_p13 = scmp.ge.s32.totalorder %s737_s24, 4   ;;  %s878_s12 = smov %s646_s13 }
 0x145   : > { %s879_s13 = smov %s650_s14  ;;  %s880_s14 = smov %s754_s5 }
 0x146   : > { %s881_s15 = smov %s737_s24  ;;  %19 = sbr.rel (!%p17_p13) target bundleno = 6 (0x6), region = 81 }
 0x14b   :  { %349 = vsyncpa [#allocation3], 1 }
 0x14c   :  { %351 = vsyncpa [#allocation3 + $0x1], 1 }
 0x14d   :  { %352 = vsyncpa [#allocation6], 1 }
 0x14e   :  { %353 = vsyncpa [#allocation4], 1 }
 0x14f   :  { %355 = vsyncpa [#allocation4 + $0x1], 1 }

// kernel: tpu_custom_call.1
= control target key start
LH: loop header
LB: loop body
LE: loop exit
PB: predicated region body
PF: predicated region fallthrough
CT: control target
= control target key end

     0   :  { %8 = vsyncpa [#allocation3], 0  ;;  %s856_s0 = inlined_call_operand.hbm [shape: f32[16,128], index: 0, kind: input, shape index: {}]   ;;  %s857_s1 = inlined_call_operand.hbm [shape: bf16[128,128], index: 1, kind: input, shape index: {}]   ;;  %s858_s2 = inlined_call_operand.vmem [shape: f32[1,128], index: 2, kind: input, shape index: {}]   ;;  %s859_s3 = inlined_call_operand.hbm [shape: f32[16,128], index: 3, kind: output, shape index: {}]  }
   0x1   :  { %10 = vsyncpa [#allocation3 + $0x1], 0 }
   0x2   :  { %11 = vsyncpa [#allocation6], 0 }
   0x3   :  { %12 = vsyncpa [#allocation4], 0 }
   0x4   :  { %14 = vsyncpa [#allocation4 + $0x1], 0  ;;  %s683_s12 = smov 0   ;;  %s685_s13 = smov 0  }
   0x5   :  { %s687_s14 = smov 0   ;;  %s689_s15 = smov 0  }
   0x6 LB: > { %s704_s16 = sadd.s32 4294967295, %s654_s15   ;;  %s411_s17 = sadd.s32 4294967294, %s654_s15   ;;  %s654_s15 = sphi %s689_s15, %s881_s15   ;;  %s650_s14 = sphi %s687_s14, %s880_s14   ;;  %s646_s13 = sphi %s685_s13, %s879_s13   ;;  %s642_s12 = sphi %s683_s12, %s878_s12  }
   0x7   : > { %p40_p0 = scmp.ne.s32.totalorder %s646_s13, %s642_s12  ;;  %p860_p1 = scmp.eq.s32.totalorder %s704_s16, 0 }
   0x8   : > { %p112_p3 = scmp.eq.s32.totalorder %s411_s17, 1  ;;  %p412_p5 = scmp.ge.s32.totalorder %s654_s15, 1 }
   0x9   : > { %p713_p4 = por %p860_p1, %p40_p0  ;;  %p119_p7 = scmp.lt.s32.totalorder %s654_s15, 3 }
   0xa   : > { %p718_p6 = por %p112_p3, %p40_p0  ;;  %s656_s21 = smov [#allocation5]  }
   0xb   : > { %s864_s18 = scalar_select %p713_p4, 1, 0 }
   0xc   : > { %s865_s19 = scalar_select %p718_p6, 1, 0 }
   0xd   : > { %p723_p8 = pnand %p412_p5, %p119_p7  ;;  %s131_s22 = sshll.u32 %s656_s21, 4  ;;  %s132_s22 = int_to_ptr.vmem [resolvable:$true] %s131_s22 }
   0xe   : > { %s737_s24 = sadd.s32 1, %s654_s15   ;;  %s27_s25 = sadd.s32 1, %s650_s14 }
   0xf   : > { %s866_s20 = scalar_select %p723_p8, 1, 0 }
  0x10   : > { %p471_p9 = pneg %p723_p8  ;;  %s24_s26 = ssub.s32 %s654_s15, %s737_s24 }
  0x11   : > { %s543_s27 = scalar_lea.vmem %s132_s22, 1024  ;;  %p551_p5 = scmp.lt.s32.totalorder %s132_s22, %s132_s22 }
  0x12   : > { %p732_p11 = pnand %p471_p9, %p860_p1  ;;  %p544_p13 = scmp.ne.s32.totalorder %s132_s22, %s543_s27 }
  0x13   : > { %p552_p7 = scmp.lt.s32.totalorder %s543_s27, %s543_s27 }
  0x14   : > { %p534_p12 = pneg %p732_p11 }
  0x15   : > { %p553_p10 = por %p552_p7, %p551_p5 }
  0x16   : > { %p546_p0 = pnand %p544_p13, %p534_p12 }
  0x18   : > { %p547_p3 = pneg %p546_p0 }
  0x1a   : > { %p554_p2 = pnand %p553_p10, %p547_p3 }
  0x1c   : > { %557 = shalt.err (!%p554_p2)
}
  0x1d   : > { %s657_s28 = smov 64   ;;  %s658_s29 = smov 4  }
  0x1e   : > { %474 = dma.hbm_to_vmem [thread:$0]  (!%p732_p11), %s857_s1, 1024, %s132_s22, [#allocation6], %s657_s28, %s657_s28, %s658_s29  }
  0x1f   : > { %p25_p9 = scmp.eq.s32.totalorder %s24_s26, 0  ;;  %p34_p12 = scmp.ne.s32.totalorder %s650_s14, %s646_s13 }
  0x20   : > { %p35_p10 = scmp.eq.s32.totalorder %s654_s15, 0  ;;  %p484_p2 = scmp.lt.s32.totalorder %s654_s15, 2 }
  0x21   : > { %s754_s5 = scalar_select %p25_p9, %s650_s14, %s27_s25  }
  0x22   : > { %p36_p13 = por %p35_p10, %p34_p12  ;;  %p868_p0 = scmp.eq.s32.totalorder %s704_s16, 1 }
  0x23   : > { %s148_s7 = sand.u32 1, %s650_s14   ;;  %s416_s8 = sshll.u32 %s654_s15, 7 }
  0x24   : > { %p758_p3 = por %p868_p0, %p34_p12  ;;  %s415_s9 = sshll.u32 %s148_s7, 3 }
  0x25   : > { %s767_s17 = scalar_lea.hbm %s856_s0, %s416_s8  ;;  %s152_s21 = scalar_lea.vmem [#allocation2], %s415_s9 }
  0x26   : > { %s869_s6 = scalar_select %p758_p3, 1, 0 }
  0x27   : > { %s159_s22 = sshll.u32 %s152_s21, 4  ;;  %p769_p11 = pnand %p484_p2, %p36_p13  ;;  %s160_s22 = int_to_ptr.vmem [resolvable:$true] %s159_s22 }
  0x28   : > { %s149_s25 = scalar_lea.sflag [#allocation3], %s148_s7  ;;  %s558_s26 = scalar_lea.hbm %s767_s17, 128 }
  0x29   : > { %p559_p5 = scmp.ne.s32.totalorder %s767_s17, %s558_s26  ;;  %p560_p7 = pneg %p769_p11 }
  0x2a   : > { %s563_s29 = scalar_lea.hbm %s856_s0, 256  ;;  %p564_p10 = scmp.lt.s32.totalorder %s767_s17, %s856_s0 }
  0x2b   : > { %p561_p9 = pnand %p560_p7, %p559_p5  ;;  %p565_p2 = scmp.lt.s32.totalorder %s563_s29, %s558_s26 }
  0x2d   : > { %p562_p12 = pneg %p561_p9  ;;  %p566_p13 = por %p565_p2, %p564_p10 }
  0x2f   : > { %p567_p0 = pnand %p566_p13, %p562_p12 }
  0x31   : > { %570 = shalt.err (!%p567_p0)
}
  0x32   : > { %s571_s8 = scalar_lea.vmem %s160_s22, 128  ;;  %s659_s7 = smov [#allocation2]  }
  0x33   : > { %p572_p1 = scmp.ne.s32.totalorder %s160_s22, %s571_s8  ;;  %s576_s9 = sshll.u32 %s659_s7, 4  ;;  %s577_s9 = int_to_ptr.vmem [resolvable:$false] %s576_s9 }
  0x34   : > { %s578_s10 = scalar_lea.vmem %s577_s9, 256  ;;  %p579_p5 = scmp.lt.s32.totalorder %s160_s22, %s577_s9 }
  0x35   : > { %p574_p6 = pnand %p572_p1, %p560_p7  ;;  %p580_p9 = scmp.lt.s32.totalorder %s578_s10, %s571_s8 }
  0x37   : > { %p575_p3 = pneg %p574_p6  ;;  %p581_p4 = por %p580_p9, %p579_p5 }
  0x39   : > { %p582_p8 = pnand %p581_p4, %p575_p3 }
  0x3b   : > { %585 = shalt.err (!%p582_p8)
}
  0x3c   : > { %478 = dma.hbm_to_vmem [thread:$0]  (!%p769_p11), %s767_s17, 128, %s160_s22, %s149_s25  }
  0x3d   : > { %p871_p12 = scmp.ne.s32.totalorder %s866_s20, 0 }
  0x3e   : > { %s790_s11 = sand.u32 (!%p871_p12), 1, %s646_s13   ;;  %p872_p1 = scmp.ne.s32.totalorder (!%p871_p12), %s864_s18, 0 }
  0x3f   : > { %168 = sbr.rel (%p871_p12) target bundleno = 316 (0x13c), region = 32  ;;  %s418_s21 = sshll.u32 (!%p871_p12), %s790_s11, 3 }
  0x40   : > { %s171_s26 = scalar_lea.sflag (!%p871_p12), [#allocation3], %s790_s11  ;;  %s174_s27 = scalar_lea.vmem (!%p871_p12), [#allocation2], %s418_s21 }
  0x44   : > { %629 = dma.done.wait (%p872_p1), %s171_s26, 128  }
  0x45   : > { %631 = vsyncadd (%p872_p1), %s171_s26, 4294967168  ;;  %p873_p4 = scmp.eq.s32.totalorder %s704_s16, 0 }
  0x47   : > { %633 = dma.done.wait (%p873_p4), [#allocation6], 1024   ;;  %p874_p6 = pmov %p873_p4 }
  0x48   : > { %v660_v0 = vmov 0.0   ;;  %vm661_vm0 = vmmov 0   ;;  %v524_v1 = vld [vmem:[#allocation5 + $0x38] sm:$0xff]   ;;  %v525_v2 = vld [vmem:[#allocation5 + $0x30] sm:$0xff]   ;;  %v526_v3 = vld [vmem:[#allocation5 + $0x28] sm:$0xff]   ;;  %s431_s17 = sshll.u32 %s704_s16, 7 }
  0x49   : > { %635 = vsyncadd (%p874_p6), [#allocation6], 4294966272  ;;  %443 = vmatprep.subr.bf16.mxu0 %v660_v0  ;;  %459 = vmatprep.mubr.msk.bf16.mxu0 %vm661_vm0, %v660_v0  ;;  %v527_v4 = vld [vmem:[#allocation5 + $0x20] sm:$0xff]   ;;  %v528_v5 = vld [vmem:[#allocation5 + $0x18] sm:$0xff]   ;;  %s200_s22 = scalar_lea.vmem [#allocation7], %s418_s21  ;;  %s813_s29 = scalar_lea.hbm %s859_s3, %s431_s17 }
  0x4a   : > { %444 = vmatpush3.bf16.msra.mxu0 %v524_v1  ;;  %v529_v6 = vld [vmem:[#allocation5 + $0x10] sm:$0xff]   ;;  %v530_v7 = vld [vmem:[#allocation5 + $0x8] sm:$0xff]   ;;  %v531_v8 = vld [vmem:[#allocation5] sm:$0xff]   ;;  %s331_s23 = sshll.u32 %s200_s22, 4  ;;  %s318_s16 = scalar_lea.sflag [#allocation4], %s790_s11  ;;  %s815_s23 = int_to_ptr.vmem [resolvable:$true] %s331_s23 }
  0x4b   : > { %445 = vmatprep.subr.bf16.mxu0 %v660_v0  ;;  %v202_v9 = vld [vmem:[%s174_s27] sm:$0xff]  ;;  %s586_s30 = scalar_lea.vmem %s815_s23, 128  ;;  %p875_p3 = scmp.ne.s32.totalorder %s869_s6, 0 }
  0x4c   : > { %v203_v10 = vpack.c.bf16 %v202_v9, %v202_v9  ;;  %v421_v11 = vld [vmem:[%s858_s2] ss:$0 sm:$0xff]  ;;  %p587_p8 = scmp.ne.s32.totalorder %s815_s23, %s586_s30  ;;  %s662_s4 = smov [#allocation7]  }
  0x4d   : > { %s590_s8 = sshll.u32 %s662_s4, 4  ;;  %s591_s8 = int_to_ptr.vmem [resolvable:$false] %s590_s8 }
  0x4e   : > { %446 = vmatpush3.bf16.msra.mxu0 %v525_v2  ;;  %p588_p11 = pnand %p587_p8, %p875_p3  ;;  %s592_s7 = scalar_lea.vmem %s591_s8, 256 }
  0x4f   : > { %447 = vmatprep.subr.bf16.mxu0 %v660_v0  ;;  %p593_p10 = scmp.lt.s32.totalorder %s815_s23, %s591_s8  ;;  %p594_p2 = scmp.lt.s32.totalorder %s592_s7, %s586_s30 }
  0x50   : > { %p589_p7 = pneg %p588_p11 }
  0x51   : > { %p595_p13 = por %p594_p2, %p593_p10 }
  0x52   : > { %448 = vmatpush3.bf16.msra.mxu0 %v526_v3 }
  0x53   : > { %449 = vmatprep.subr.bf16.mxu0 %v660_v0  ;;  %p596_p0 = pnand %p595_p13, %p589_p7 }
  0x56   : > { %450 = vmatpush3.bf16.msra.mxu0 %v527_v4 }
  0x57   : > { %451 = vmatprep.subr.bf16.mxu0 %v660_v0 }
  0x5a   : > { %452 = vmatpush3.bf16.msra.mxu0 %v528_v5 }
  0x5b   : > { %453 = vmatprep.subr.bf16.mxu0 %v660_v0 }
  0x5e   : > { %454 = vmatpush3.bf16.msra.mxu0 %v529_v6 }
  0x5f   : > { %455 = vmatprep.subr.bf16.mxu0 %v660_v0 }
  0x62   : > { %456 = vmatpush3.bf16.msra.mxu0 %v530_v7 }
  0x63   : > { %457 = vmatprep.subr.bf16.mxu0 %v660_v0 }
  0x66   : > { %458 = vmatpush3.bf16.msra.mxu0 %v531_v8 }
  0x69   : > { %460 = vmatmul.mubr.bf16.vlgmr.msra.gmra.mxu0 %v203_v10 }
 0x129   : > { %v309_v12 = vpop.f32.mrf.mxu0 }
 0x12a   : > { %v310_v13 = vadd.f32 %v421_v11, %v309_v12 }
 0x12b   : > { %v461_v14 = vpop.f32.mrf.mxu0 }
 0x12c   : > { %v315_v15 = vadd.f32 %v310_v13, %v202_v9 }
 0x12d   : > { %v312_v16 = vpop.f32.mrf.mxu0 }
 0x12e   : > { %316 = vst [vmem:[%s200_s22] sm:$0xff] %v315_v15 }
 0x12f   : > { %v462_v17 = vpop.f32.mrf.mxu0 }
 0x130   : > { %599 = shalt.err (!%p596_p0)
}
 0x131   : > { %s600_s9 = scalar_lea.hbm %s813_s29, 128  ;;  %s604_s21 = scalar_lea.hbm %s859_s3, 256 }
 0x132   : > { %p601_p5 = scmp.ne.s32.totalorder %s813_s29, %s600_s9  ;;  %p605_p1 = scmp.lt.s32.totalorder %s813_s29, %s859_s3 }
 0x133   : > { %p606_p4 = scmp.lt.s32.totalorder %s604_s21, %s600_s9 }
 0x134   : > { %p602_p9 = pnand %p601_p5, %p875_p3 }
 0x135   : > { %p607_p6 = por %p606_p4, %p605_p1 }
 0x136   : > { %p603_p12 = pneg %p602_p9 }
 0x138   : > { %p608_p8 = pnand %p607_p6, %p603_p12 }
 0x13a   : > { %611 = shalt.err (!%p608_p8)
}
 0x13b   : > { %469 = dma.vmem_to_hbm [thread:$0]  (%p875_p3), %s815_s23, 128, %s813_s29, %s318_s16  }
 0x13c PF: > { %s343_s18 = sand.u32 1, %s642_s12   ;;  %p876_p11 = scmp.ne.s32.totalorder %s865_s19, 0 }
 0x13d   : > { %p877_p7 = scmp.ge.s32.totalorder %s654_s15, 2  ;;  %s344_s20 = scalar_lea.sflag [#allocation4], %s343_s18 }
 0x13f   : > { %p480_p10 = pnand %p877_p7, %p876_p11 }
 0x141   : > { %p481_p2 = pneg %p480_p10 }
 0x143   : > { %637 = dma.done.wait (%p481_p2), %s344_s20, 128  }
 0x144   : > { %639 = vsyncadd (%p481_p2), %s344_s20, 4294967168  ;;  %p17_p13 = scmp.ge.s32.totalorder %s737_s24, 4   ;;  %s878_s12 = smov %s646_s13 }
 0x145   : > { %s879_s13 = smov %s650_s14  ;;  %s880_s14 = smov %s754_s5 }
 0x146   : > { %s881_s15 = smov %s737_s24  ;;  %19 = sbr.rel (!%p17_p13) target bundleno = 6 (0x6), region = 81 }
 0x14b   :  { %349 = vsyncpa [#allocation3], 1 }
 0x14c   :  { %351 = vsyncpa [#allocation3 + $0x1], 1 }
 0x14d   :  { %352 = vsyncpa [#allocation6], 1 }
 0x14e   :  { %353 = vsyncpa [#allocation4], 1 }
 0x14f   :  { %355 = vsyncpa [#allocation4 + $0x1], 1 }

</bundles_post_ra>
